<compile_context>
chip_gen: v6e
topology: v6e:2x2x1
jax: 0.10.0
libtpu: 0.0.40
codegen_flags: <defaults>
</compile_context>

<pallas_src>
import functools
import math

import jax
import jax.numpy as jnp
from jax.experimental import pallas as pl
from jax.experimental.pallas import tpu as pltpu


def mhsa_kernel(q_ref, k_ref, v_ref,
                wq_ref, bq_ref, wk_ref, bk_ref, wv_ref, bv_ref,
                wd_ref, bd_ref,
                out_ref,
                *, n_heads, head_dim):
    f32 = jnp.float32
    bf16 = jnp.bfloat16

    def project(x_ref, w_ref, b_ref):
        # activations cast to bf16 for the MXU, weights already bf16, f32 accumulation,
        # bias add in f32.
        x = x_ref[...].astype(bf16)
        return jnp.dot(x, w_ref[...], preferred_element_type=f32) + b_ref[...]

    q = project(q_ref, wq_ref, bq_ref)          # (S, F) f32
    k = project(k_ref, wk_ref, bk_ref)          # (S, F) f32
    v = project(v_ref, wv_ref, bv_ref)          # (S, F) f32

    # Fold the 1/sqrt(d_k) attention scale into q once (S*F mults instead of per-score).
    q = q * (1.0 / math.sqrt(head_dim))

    # Per-head attention via static lane slices (no reshape/transpose relayout in VMEM).
    head_outs = []
    for h in range(n_heads):
        lo, hi = h * head_dim, (h + 1) * head_dim
        qh = q[:, lo:hi].astype(bf16)           # (S, Dh)
        kh = k[:, lo:hi].astype(bf16)           # (S, Dh)
        vh = v[:, lo:hi].astype(bf16)           # (S, Dh)

        s = jnp.einsum("qd,kd->qk", qh, kh, preferred_element_type=f32)     # (S, S) MXU
        s = s - jnp.max(s, axis=-1, keepdims=True)
        e = jnp.exp(s)
        inv = pl.reciprocal(jnp.sum(e, axis=-1, keepdims=True), approx=True)
        attn = (e * inv).astype(bf16)                                       # f32 softmax, bf16 for MXU
        head_outs.append(
            jnp.einsum("qk,kd->qd", attn, vh, preferred_element_type=f32))  # (S, Dh) MXU

    # Merge heads (lane concat in head order == torch transpose+reshape), then dense.
    attn_out = jnp.concatenate(head_outs, axis=-1).astype(bf16)             # (S, F)
    out = jnp.dot(attn_out, wd_ref[...], preferred_element_type=f32) + bd_ref[...]

    # Single full-width store of the whole (S, F) tile.
    # TODO(synk): feature_dim=32 < 128 lanes -> masked vst; at real scale pad/pack the
    # output lane dim to a multiple of 128 at the model boundary.
    out_ref[...] = out


def self_attention_base(q, k, v, params, n_heads):
    B, S, Din = q.shape
    F = params["wq"].shape[1]
    assert F % n_heads == 0
    head_dim = F // n_heads

    # Weights in bf16 (halves weight DMA, MXU-native on v5e/v6e/v7x); biases stay f32.
    wq = params["wq"].astype(jnp.bfloat16)
    wk = params["wk"].astype(jnp.bfloat16)
    wv = params["wv"].astype(jnp.bfloat16)
    wd = params["wd"].astype(jnp.bfloat16)

    kernel = functools.partial(mhsa_kernel, n_heads=n_heads, head_dim=head_dim)

    # Batch grid: one batch row per step (squeezed leading dim), weights resident via
    # constant index_maps. Batch axis is embarrassingly parallel -> megacore on v7x.
    x_spec = pl.BlockSpec((None, S, Din), lambda b: (b, 0, 0))
    w_in_spec = pl.BlockSpec((Din, F), lambda b: (0, 0))
    w_ff_spec = pl.BlockSpec((F, F), lambda b: (0, 0))
    b_spec = pl.BlockSpec((1, F), lambda b: (0, 0))
    out_spec = pl.BlockSpec((None, S, F), lambda b: (b, 0, 0))

    return pl.pallas_call(
        kernel,
        out_shape=jax.ShapeDtypeStruct((B, S, F), jnp.float32),
        grid=(B,),
        in_specs=[x_spec, x_spec, x_spec,
                  w_in_spec, b_spec,
                  w_in_spec, b_spec,
                  w_in_spec, b_spec,
                  w_ff_spec, b_spec],
        out_specs=out_spec,
        compiler_params=pltpu.CompilerParams(
            dimension_semantics=("parallel",)),
    )(q, k, v, wq, params["bq"], wk, params["bk"], wv, params["bv"], wd, params["bd"])


def make_params(key, input_dim, feature_dim):
    ks = jax.random.split(key, 4)

    def lin(k, fan_in, fan_out):
        kw, kb = jax.random.split(k)
        bound = 1.0 / math.sqrt(fan_in)
        w = jax.random.uniform(kw, (fan_in, fan_out), jnp.float32, -bound, bound)
        b = jax.random.uniform(kb, (1, fan_out), jnp.float32, -bound, bound)
        return w, b

    wq, bq = lin(ks[0], input_dim, feature_dim)
    wk, bk = lin(ks[1], input_dim, feature_dim)
    wv, bv = lin(ks[2], input_dim, feature_dim)
    wd, bd = lin(ks[3], feature_dim, feature_dim)
    return dict(wq=wq, bq=bq, wk=wk, bk=bk, wv=wv, bv=bv, wd=wd, bd=bd)


def reference(q, k, v, p, n_heads):
    # Pure-JAX f32 reference mirroring the PyTorch forward exactly.
    B, S, _ = q.shape
    F = p["wq"].shape[1]
    Dh = F // n_heads

    q = q @ p["wq"] + p["bq"]
    k = k @ p["wk"] + p["bk"]
    v = v @ p["wv"] + p["bv"]

    def split(x):
        return x.reshape(B, S, n_heads, Dh).transpose(0, 2, 1, 3)   # (B, H, S, Dh)

    qh, kh, vh = split(q), split(k), split(v)
    scores = jnp.einsum("bhqd,bhkd->bhqk", qh, kh) / jnp.sqrt(jnp.float32(Dh))
    w = jax.nn.softmax(scores, axis=-1)
    o = jnp.einsum("bhqk,bhkd->bhqd", w, vh)
    o = o.transpose(0, 2, 1, 3).reshape(B, S, F)
    return o @ p["wd"] + p["bd"]


if __name__ == "__main__":
    key = jax.random.PRNGKey(0)
    B, S = 2, 8
    input_dim, feature_dim, n_heads = 16, 32, 4

    k_params, k_q, k_k, k_v = jax.random.split(key, 4)
    params = make_params(k_params, input_dim, feature_dim)
    q = jax.random.normal(k_q, (B, S, input_dim), jnp.float32)
    k = jax.random.normal(k_k, (B, S, input_dim), jnp.float32)
    v = jax.random.normal(k_v, (B, S, input_dim), jnp.float32)

    out = self_attention_base(q, k, v, params, n_heads)
    out = jax.block_until_ready(out)

    ref = reference(q, k, v, params, n_heads)
    assert out.shape == (B, S, feature_dim)
    # Tolerance accounts for bf16 MXU inputs (f32 accumulation) + approx reciprocal.
    assert jnp.allclose(out, ref, rtol=2e-2, atol=2e-2), float(jnp.max(jnp.abs(out - ref)))

    print("KERNEL_OK")
</pallas_src>

<mosaic_0001>
module attributes {stable_mosaic.version = 11 : i64} {
  func.func @mhsa_kernel(%arg0: i32, %arg1: memref<1x8x16xf32, #tpu.memory_space<vmem>>, %arg2: memref<1x8x16xf32, #tpu.memory_space<vmem>>, %arg3: memref<1x8x16xf32, #tpu.memory_space<vmem>>, %arg4: memref<16x32xbf16, #tpu.memory_space<vmem>>, %arg5: memref<1x32xf32, #tpu.memory_space<vmem>>, %arg6: memref<16x32xbf16, #tpu.memory_space<vmem>>, %arg7: memref<1x32xf32, #tpu.memory_space<vmem>>, %arg8: memref<16x32xbf16, #tpu.memory_space<vmem>>, %arg9: memref<1x32xf32, #tpu.memory_space<vmem>>, %arg10: memref<32x32xbf16, #tpu.memory_space<vmem>>, %arg11: memref<1x32xf32, #tpu.memory_space<vmem>>, %arg12: memref<1x8x32xf32, #tpu.memory_space<vmem>>) attributes {dimension_semantics = [#tpu.dimension_semantics<parallel>], iteration_bounds = array<i64: 2>, scalar_prefetch = 0 : i64, scratch_operands = 0 : i64, tpu.core_type = #tpu.core_type<tc>, window_params = [{transform_indices = @transform_0, window_bounds = array<i64: 1, 8, 16>}, {transform_indices = @transform_1, window_bounds = array<i64: 1, 8, 16>}, {transform_indices = @transform_2, window_bounds = array<i64: 1, 8, 16>}, {pipeline_mode = #tpu.pipeline_mode<synchronous>, transform_indices = @transform_3, window_bounds = array<i64: 16, 32>}, {pipeline_mode = #tpu.pipeline_mode<synchronous>, transform_indices = @transform_4, window_bounds = array<i64: 1, 32>}, {pipeline_mode = #tpu.pipeline_mode<synchronous>, transform_indices = @transform_5, window_bounds = array<i64: 16, 32>}, {pipeline_mode = #tpu.pipeline_mode<synchronous>, transform_indices = @transform_6, window_bounds = array<i64: 1, 32>}, {pipeline_mode = #tpu.pipeline_mode<synchronous>, transform_indices = @transform_7, window_bounds = array<i64: 16, 32>}, {pipeline_mode = #tpu.pipeline_mode<synchronous>, transform_indices = @transform_8, window_bounds = array<i64: 1, 32>}, {pipeline_mode = #tpu.pipeline_mode<synchronous>, transform_indices = @transform_9, window_bounds = array<i64: 32, 32>}, {pipeline_mode = #tpu.pipeline_mode<synchronous>, transform_indices = @transform_10, window_bounds = array<i64: 1, 32>}, {transform_indices = @transform_11, window_bounds = array<i64: 1, 8, 32>}]} {
    %c0 = arith.constant 0 : index
    %c0_0 = arith.constant 0 : index
    %c0_1 = arith.constant 0 : index
    %0 = vector.load %arg1[%c0, %c0_0, %c0_1] : memref<1x8x16xf32, #tpu.memory_space<vmem>>, vector<1x8x16xf32>
    %1 = vector.shape_cast %0 : vector<1x8x16xf32> to vector<8x16xf32>
    %2 = arith.truncf %1 : vector<8x16xf32> to vector<8x16xbf16>
    %c0_2 = arith.constant 0 : index
    %c0_3 = arith.constant 0 : index
    %3 = vector.load %arg4[%c0_2, %c0_3] : memref<16x32xbf16, #tpu.memory_space<vmem>>, vector<16x32xbf16>
    %cst = arith.constant dense<0.000000e+00> : vector<8x32xf32>
    %4 = tpu.matmul %2, %3, %cst {dimension_numbers = #tpu.dot_dimension_numbers<[1], [0], [0], [1], [0, 0, 1, 1], [], []>} : vector<8x16xbf16>, vector<16x32xbf16>, vector<8x32xf32> -> vector<8x32xf32>
    %c0_4 = arith.constant 0 : index
    %c0_5 = arith.constant 0 : index
    %5 = vector.load %arg5[%c0_4, %c0_5] : memref<1x32xf32, #tpu.memory_space<vmem>>, vector<1x32xf32>
    %6 = vector.broadcast %5 : vector<1x32xf32> to vector<8x32xf32>
    %7 = arith.addf %4, %6 : vector<8x32xf32>
    %c0_6 = arith.constant 0 : index
    %c0_7 = arith.constant 0 : index
    %c0_8 = arith.constant 0 : index
    %8 = vector.load %arg2[%c0_6, %c0_7, %c0_8] : memref<1x8x16xf32, #tpu.memory_space<vmem>>, vector<1x8x16xf32>
    %9 = vector.shape_cast %8 : vector<1x8x16xf32> to vector<8x16xf32>
    %10 = arith.truncf %9 : vector<8x16xf32> to vector<8x16xbf16>
    %c0_9 = arith.constant 0 : index
    %c0_10 = arith.constant 0 : index
    %11 = vector.load %arg6[%c0_9, %c0_10] : memref<16x32xbf16, #tpu.memory_space<vmem>>, vector<16x32xbf16>
    %cst_11 = arith.constant dense<0.000000e+00> : vector<8x32xf32>
    %12 = tpu.matmul %10, %11, %cst_11 {dimension_numbers = #tpu.dot_dimension_numbers<[1], [0], [0], [1], [0, 0, 1, 1], [], []>} : vector<8x16xbf16>, vector<16x32xbf16>, vector<8x32xf32> -> vector<8x32xf32>
    %c0_12 = arith.constant 0 : index
    %c0_13 = arith.constant 0 : index
    %13 = vector.load %arg7[%c0_12, %c0_13] : memref<1x32xf32, #tpu.memory_space<vmem>>, vector<1x32xf32>
    %14 = vector.broadcast %13 : vector<1x32xf32> to vector<8x32xf32>
    %15 = arith.addf %12, %14 : vector<8x32xf32>
    %c0_14 = arith.constant 0 : index
    %c0_15 = arith.constant 0 : index
    %c0_16 = arith.constant 0 : index
    %16 = vector.load %arg3[%c0_14, %c0_15, %c0_16] : memref<1x8x16xf32, #tpu.memory_space<vmem>>, vector<1x8x16xf32>
    %17 = vector.shape_cast %16 : vector<1x8x16xf32> to vector<8x16xf32>
    %18 = arith.truncf %17 : vector<8x16xf32> to vector<8x16xbf16>
    %c0_17 = arith.constant 0 : index
    %c0_18 = arith.constant 0 : index
    %19 = vector.load %arg8[%c0_17, %c0_18] : memref<16x32xbf16, #tpu.memory_space<vmem>>, vector<16x32xbf16>
    %cst_19 = arith.constant dense<0.000000e+00> : vector<8x32xf32>
    %20 = tpu.matmul %18, %19, %cst_19 {dimension_numbers = #tpu.dot_dimension_numbers<[1], [0], [0], [1], [0, 0, 1, 1], [], []>} : vector<8x16xbf16>, vector<16x32xbf16>, vector<8x32xf32> -> vector<8x32xf32>
    %c0_20 = arith.constant 0 : index
    %c0_21 = arith.constant 0 : index
    %21 = vector.load %arg9[%c0_20, %c0_21] : memref<1x32xf32, #tpu.memory_space<vmem>>, vector<1x32xf32>
    %22 = vector.broadcast %21 : vector<1x32xf32> to vector<8x32xf32>
    %23 = arith.addf %20, %22 : vector<8x32xf32>
    %cst_22 = arith.constant 0.353553385 : f32
    %24 = vector.broadcast %cst_22 : f32 to vector<8x32xf32>
    %25 = arith.mulf %7, %24 : vector<8x32xf32>
    %26 = vector.extract_strided_slice %25 {offsets = [0, 0], sizes = [8, 8], strides = [1, 1]} : vector<8x32xf32> to vector<8x8xf32>
    %27 = arith.truncf %26 : vector<8x8xf32> to vector<8x8xbf16>
    %28 = vector.extract_strided_slice %15 {offsets = [0, 0], sizes = [8, 8], strides = [1, 1]} : vector<8x32xf32> to vector<8x8xf32>
    %29 = arith.truncf %28 : vector<8x8xf32> to vector<8x8xbf16>
    %30 = vector.extract_strided_slice %23 {offsets = [0, 0], sizes = [8, 8], strides = [1, 1]} : vector<8x32xf32> to vector<8x8xf32>
    %31 = arith.truncf %30 : vector<8x8xf32> to vector<8x8xbf16>
    "tpu.trace_start"() <{level = 10 : i32, message = "qd,kd->qk"}> : () -> ()
    %cst_23 = arith.constant dense<0.000000e+00> : vector<8x8xf32>
    %32 = tpu.matmul %27, %29, %cst_23 {dimension_numbers = #tpu.dot_dimension_numbers<[1], [1], [0], [0], [0, 0, 1, 0], [], []>} : vector<8x8xbf16>, vector<8x8xbf16>, vector<8x8xf32> -> vector<8x8xf32>
    "tpu.trace_stop"() : () -> ()
    %cst_24 = arith.constant dense<0xFF800000> : vector<8xf32>
    %33 = vector.multi_reduction <maximumf>, %32, %cst_24 [1] : vector<8x8xf32> to vector<8xf32>
    %34 = vector.shape_cast %33 : vector<8xf32> to vector<8x1xf32>
    %35 = vector.broadcast %34 : vector<8x1xf32> to vector<8x8xf32>
    %36 = arith.subf %32, %35 : vector<8x8xf32>
    %37 = math.exp %36 : vector<8x8xf32>
    %cst_25 = arith.constant dense<0.000000e+00> : vector<8xf32>
    %38 = vector.multi_reduction <add>, %37, %cst_25 [1] : vector<8x8xf32> to vector<8xf32>
    %39 = vector.shape_cast %38 : vector<8xf32> to vector<8x1xf32>
    %40 = tpu.reciprocal %39 {approx = true} : vector<8x1xf32> -> vector<8x1xf32>
    %41 = vector.broadcast %40 : vector<8x1xf32> to vector<8x8xf32>
    %42 = arith.mulf %37, %41 : vector<8x8xf32>
    %43 = arith.truncf %42 : vector<8x8xf32> to vector<8x8xbf16>
    "tpu.trace_start"() <{level = 10 : i32, message = "qk,kd->qd"}> : () -> ()
    %cst_26 = arith.constant dense<0.000000e+00> : vector<8x8xf32>
    %44 = tpu.matmul %43, %31, %cst_26 {dimension_numbers = #tpu.dot_dimension_numbers<[1], [0], [0], [1], [0, 0, 1, 1], [], []>} : vector<8x8xbf16>, vector<8x8xbf16>, vector<8x8xf32> -> vector<8x8xf32>
    "tpu.trace_stop"() : () -> ()
    %45 = vector.extract_strided_slice %25 {offsets = [0, 8], sizes = [8, 8], strides = [1, 1]} : vector<8x32xf32> to vector<8x8xf32>
    %46 = arith.truncf %45 : vector<8x8xf32> to vector<8x8xbf16>
    %47 = vector.extract_strided_slice %15 {offsets = [0, 8], sizes = [8, 8], strides = [1, 1]} : vector<8x32xf32> to vector<8x8xf32>
    %48 = arith.truncf %47 : vector<8x8xf32> to vector<8x8xbf16>
    %49 = vector.extract_strided_slice %23 {offsets = [0, 8], sizes = [8, 8], strides = [1, 1]} : vector<8x32xf32> to vector<8x8xf32>
    %50 = arith.truncf %49 : vector<8x8xf32> to vector<8x8xbf16>
    "tpu.trace_start"() <{level = 10 : i32, message = "qd,kd->qk"}> : () -> ()
    %cst_27 = arith.constant dense<0.000000e+00> : vector<8x8xf32>
    %51 = tpu.matmul %46, %48, %cst_27 {dimension_numbers = #tpu.dot_dimension_numbers<[1], [1], [0], [0], [0, 0, 1, 0], [], []>} : vector<8x8xbf16>, vector<8x8xbf16>, vector<8x8xf32> -> vector<8x8xf32>
    "tpu.trace_stop"() : () -> ()
    %cst_28 = arith.constant dense<0xFF800000> : vector<8xf32>
    %52 = vector.multi_reduction <maximumf>, %51, %cst_28 [1] : vector<8x8xf32> to vector<8xf32>
    %53 = vector.shape_cast %52 : vector<8xf32> to vector<8x1xf32>
    %54 = vector.broadcast %53 : vector<8x1xf32> to vector<8x8xf32>
    %55 = arith.subf %51, %54 : vector<8x8xf32>
    %56 = math.exp %55 : vector<8x8xf32>
    %cst_29 = arith.constant dense<0.000000e+00> : vector<8xf32>
    %57 = vector.multi_reduction <add>, %56, %cst_29 [1] : vector<8x8xf32> to vector<8xf32>
    %58 = vector.shape_cast %57 : vector<8xf32> to vector<8x1xf32>
    %59 = tpu.reciprocal %58 {approx = true} : vector<8x1xf32> -> vector<8x1xf32>
    %60 = vector.broadcast %59 : vector<8x1xf32> to vector<8x8xf32>
    %61 = arith.mulf %56, %60 : vector<8x8xf32>
    %62 = arith.truncf %61 : vector<8x8xf32> to vector<8x8xbf16>
    "tpu.trace_start"() <{level = 10 : i32, message = "qk,kd->qd"}> : () -> ()
    %cst_30 = arith.constant dense<0.000000e+00> : vector<8x8xf32>
    %63 = tpu.matmul %62, %50, %cst_30 {dimension_numbers = #tpu.dot_dimension_numbers<[1], [0], [0], [1], [0, 0, 1, 1], [], []>} : vector<8x8xbf16>, vector<8x8xbf16>, vector<8x8xf32> -> vector<8x8xf32>
    "tpu.trace_stop"() : () -> ()
    %64 = vector.extract_strided_slice %25 {offsets = [0, 16], sizes = [8, 8], strides = [1, 1]} : vector<8x32xf32> to vector<8x8xf32>
    %65 = arith.truncf %64 : vector<8x8xf32> to vector<8x8xbf16>
    %66 = vector.extract_strided_slice %15 {offsets = [0, 16], sizes = [8, 8], strides = [1, 1]} : vector<8x32xf32> to vector<8x8xf32>
    %67 = arith.truncf %66 : vector<8x8xf32> to vector<8x8xbf16>
    %68 = vector.extract_strided_slice %23 {offsets = [0, 16], sizes = [8, 8], strides = [1, 1]} : vector<8x32xf32> to vector<8x8xf32>
    %69 = arith.truncf %68 : vector<8x8xf32> to vector<8x8xbf16>
    "tpu.trace_start"() <{level = 10 : i32, message = "qd,kd->qk"}> : () -> ()
    %cst_31 = arith.constant dense<0.000000e+00> : vector<8x8xf32>
    %70 = tpu.matmul %65, %67, %cst_31 {dimension_numbers = #tpu.dot_dimension_numbers<[1], [1], [0], [0], [0, 0, 1, 0], [], []>} : vector<8x8xbf16>, vector<8x8xbf16>, vector<8x8xf32> -> vector<8x8xf32>
    "tpu.trace_stop"() : () -> ()
    %cst_32 = arith.constant dense<0xFF800000> : vector<8xf32>
    %71 = vector.multi_reduction <maximumf>, %70, %cst_32 [1] : vector<8x8xf32> to vector<8xf32>
    %72 = vector.shape_cast %71 : vector<8xf32> to vector<8x1xf32>
    %73 = vector.broadcast %72 : vector<8x1xf32> to vector<8x8xf32>
    %74 = arith.subf %70, %73 : vector<8x8xf32>
    %75 = math.exp %74 : vector<8x8xf32>
    %cst_33 = arith.constant dense<0.000000e+00> : vector<8xf32>
    %76 = vector.multi_reduction <add>, %75, %cst_33 [1] : vector<8x8xf32> to vector<8xf32>
    %77 = vector.shape_cast %76 : vector<8xf32> to vector<8x1xf32>
    %78 = tpu.reciprocal %77 {approx = true} : vector<8x1xf32> -> vector<8x1xf32>
    %79 = vector.broadcast %78 : vector<8x1xf32> to vector<8x8xf32>
    %80 = arith.mulf %75, %79 : vector<8x8xf32>
    %81 = arith.truncf %80 : vector<8x8xf32> to vector<8x8xbf16>
    "tpu.trace_start"() <{level = 10 : i32, message = "qk,kd->qd"}> : () -> ()
    %cst_34 = arith.constant dense<0.000000e+00> : vector<8x8xf32>
    %82 = tpu.matmul %81, %69, %cst_34 {dimension_numbers = #tpu.dot_dimension_numbers<[1], [0], [0], [1], [0, 0, 1, 1], [], []>} : vector<8x8xbf16>, vector<8x8xbf16>, vector<8x8xf32> -> vector<8x8xf32>
    "tpu.trace_stop"() : () -> ()
    %83 = vector.extract_strided_slice %25 {offsets = [0, 24], sizes = [8, 8], strides = [1, 1]} : vector<8x32xf32> to vector<8x8xf32>
    %84 = arith.truncf %83 : vector<8x8xf32> to vector<8x8xbf16>
    %85 = vector.extract_strided_slice %15 {offsets = [0, 24], sizes = [8, 8], strides = [1, 1]} : vector<8x32xf32> to vector<8x8xf32>
    %86 = arith.truncf %85 : vector<8x8xf32> to vector<8x8xbf16>
    %87 = vector.extract_strided_slice %23 {offsets = [0, 24], sizes = [8, 8], strides = [1, 1]} : vector<8x32xf32> to vector<8x8xf32>
    %88 = arith.truncf %87 : vector<8x8xf32> to vector<8x8xbf16>
    "tpu.trace_start"() <{level = 10 : i32, message = "qd,kd->qk"}> : () -> ()
    %cst_35 = arith.constant dense<0.000000e+00> : vector<8x8xf32>
    %89 = tpu.matmul %84, %86, %cst_35 {dimension_numbers = #tpu.dot_dimension_numbers<[1], [1], [0], [0], [0, 0, 1, 0], [], []>} : vector<8x8xbf16>, vector<8x8xbf16>, vector<8x8xf32> -> vector<8x8xf32>
    "tpu.trace_stop"() : () -> ()
    %cst_36 = arith.constant dense<0xFF800000> : vector<8xf32>
    %90 = vector.multi_reduction <maximumf>, %89, %cst_36 [1] : vector<8x8xf32> to vector<8xf32>
    %91 = vector.shape_cast %90 : vector<8xf32> to vector<8x1xf32>
    %92 = vector.broadcast %91 : vector<8x1xf32> to vector<8x8xf32>
    %93 = arith.subf %89, %92 : vector<8x8xf32>
    %94 = math.exp %93 : vector<8x8xf32>
    %cst_37 = arith.constant dense<0.000000e+00> : vector<8xf32>
    %95 = vector.multi_reduction <add>, %94, %cst_37 [1] : vector<8x8xf32> to vector<8xf32>
    %96 = vector.shape_cast %95 : vector<8xf32> to vector<8x1xf32>
    %97 = tpu.reciprocal %96 {approx = true} : vector<8x1xf32> -> vector<8x1xf32>
    %98 = vector.broadcast %97 : vector<8x1xf32> to vector<8x8xf32>
    %99 = arith.mulf %94, %98 : vector<8x8xf32>
    %100 = arith.truncf %99 : vector<8x8xf32> to vector<8x8xbf16>
    "tpu.trace_start"() <{level = 10 : i32, message = "qk,kd->qd"}> : () -> ()
    %cst_38 = arith.constant dense<0.000000e+00> : vector<8x8xf32>
    %101 = tpu.matmul %100, %88, %cst_38 {dimension_numbers = #tpu.dot_dimension_numbers<[1], [0], [0], [1], [0, 0, 1, 1], [], []>} : vector<8x8xbf16>, vector<8x8xbf16>, vector<8x8xf32> -> vector<8x8xf32>
    "tpu.trace_stop"() : () -> ()
    %102 = tpu.concatenate %44, %63, %82, %101 in 1 : vector<8x8xf32>, vector<8x8xf32>, vector<8x8xf32>, vector<8x8xf32> -> vector<8x32xf32>
    %103 = arith.truncf %102 : vector<8x32xf32> to vector<8x32xbf16>
    %c0_39 = arith.constant 0 : index
    %c0_40 = arith.constant 0 : index
    %104 = vector.load %arg10[%c0_39, %c0_40] : memref<32x32xbf16, #tpu.memory_space<vmem>>, vector<32x32xbf16>
    %cst_41 = arith.constant dense<0.000000e+00> : vector<8x32xf32>
    %105 = tpu.matmul %103, %104, %cst_41 {dimension_numbers = #tpu.dot_dimension_numbers<[1], [0], [0], [1], [0, 0, 1, 1], [], []>} : vector<8x32xbf16>, vector<32x32xbf16>, vector<8x32xf32> -> vector<8x32xf32>
    %c0_42 = arith.constant 0 : index
    %c0_43 = arith.constant 0 : index
    %106 = vector.load %arg11[%c0_42, %c0_43] : memref<1x32xf32, #tpu.memory_space<vmem>>, vector<1x32xf32>
    %107 = vector.broadcast %106 : vector<1x32xf32> to vector<8x32xf32>
    %108 = arith.addf %105, %107 : vector<8x32xf32>
    %c0_44 = arith.constant 0 : index
    %c0_45 = arith.constant 0 : index
    %c0_46 = arith.constant 0 : index
    %109 = vector.load %arg12[%c0_44, %c0_45, %c0_46] : memref<1x8x32xf32, #tpu.memory_space<vmem>>, vector<1x8x32xf32>
    %110 = vector.shape_cast %109 : vector<1x8x32xf32> to vector<8x32xf32>
    %111 = vector.shape_cast %108 : vector<8x32xf32> to vector<1x8x32xf32>
    tpu.vector_store %arg12[%c0_44, %c0_45, %c0_46], %111 {strides = array<i32>} : memref<1x8x32xf32, #tpu.memory_space<vmem>>, vector<1x8x32xf32>,
    return
  }
  func.func @transform_0(%arg0: i32) -> (i32, i32, i32) {
    %c0_i32 = arith.constant 0 : i32
    %c0_i32_0 = arith.constant 0 : i32
    %c0_i32_1 = arith.constant 0 : i32
    return %arg0, %c0_i32, %c0_i32_0 : i32, i32, i32
  }
  func.func @transform_1(%arg0: i32) -> (i32, i32, i32) {
    %c0_i32 = arith.constant 0 : i32
    %c0_i32_0 = arith.constant 0 : i32
    %c0_i32_1 = arith.constant 0 : i32
    return %arg0, %c0_i32, %c0_i32_0 : i32, i32, i32
  }
  func.func @transform_2(%arg0: i32) -> (i32, i32, i32) {
    %c0_i32 = arith.constant 0 : i32
    %c0_i32_0 = arith.constant 0 : i32
    %c0_i32_1 = arith.constant 0 : i32
    return %arg0, %c0_i32, %c0_i32_0 : i32, i32, i32
  }
  func.func @transform_3(%arg0: i32) -> (i32, i32) {
    %c0_i32 = arith.constant 0 : i32
    %c0_i32_0 = arith.constant 0 : i32
    %c0_i32_1 = arith.constant 0 : i32
    return %c0_i32, %c0_i32_0 : i32, i32
  }
  func.func @transform_4(%arg0: i32) -> (i32, i32) {
    %c0_i32 = arith.constant 0 : i32
    %c0_i32_0 = arith.constant 0 : i32
    %c0_i32_1 = arith.constant 0 : i32
    return %c0_i32, %c0_i32_0 : i32, i32
  }
  func.func @transform_5(%arg0: i32) -> (i32, i32) {
    %c0_i32 = arith.constant 0 : i32
    %c0_i32_0 = arith.constant 0 : i32
    %c0_i32_1 = arith.constant 0 : i32
    return %c0_i32, %c0_i32_0 : i32, i32
  }
  func.func @transform_6(%arg0: i32) -> (i32, i32) {
    %c0_i32 = arith.constant 0 : i32
    %c0_i32_0 = arith.constant 0 : i32
    %c0_i32_1 = arith.constant 0 : i32
    return %c0_i32, %c0_i32_0 : i32, i32
  }
  func.func @transform_7(%arg0: i32) -> (i32, i32) {
    %c0_i32 = arith.constant 0 : i32
    %c0_i32_0 = arith.constant 0 : i32
    %c0_i32_1 = arith.constant 0 : i32
    return %c0_i32, %c0_i32_0 : i32, i32
  }
  func.func @transform_8(%arg0: i32) -> (i32, i32) {
    %c0_i32 = arith.constant 0 : i32
    %c0_i32_0 = arith.constant 0 : i32
    %c0_i32_1 = arith.constant 0 : i32
    return %c0_i32, %c0_i32_0 : i32, i32
  }
  func.func @transform_9(%arg0: i32) -> (i32, i32) {
    %c0_i32 = arith.constant 0 : i32
    %c0_i32_0 = arith.constant 0 : i32
    %c0_i32_1 = arith.constant 0 : i32
    return %c0_i32, %c0_i32_0 : i32, i32
  }
  func.func @transform_10(%arg0: i32) -> (i32, i32) {
    %c0_i32 = arith.constant 0 : i32
    %c0_i32_0 = arith.constant 0 : i32
    %c0_i32_1 = arith.constant 0 : i32
    return %c0_i32, %c0_i32_0 : i32, i32
  }
  func.func @transform_11(%arg0: i32) -> (i32, i32, i32) {
    %c0_i32 = arith.constant 0 : i32
    %c0_i32_0 = arith.constant 0 : i32
    %c0_i32_1 = arith.constant 0 : i32
    return %arg0, %c0_i32, %c0_i32_0 : i32, i32, i32
  }
}

</mosaic_0001>

<bundles_post_ra>
// kernel: tpu_custom_call.1
= control target key start
LH: loop header
LB: loop body
LE: loop exit
PB: predicated region body
PF: predicated region fallthrough
CT: control target
= control target key end

     0   :  { %s2535_s0 = inlined_call_operand.hbm [shape: f32[2,8,16], index: 0, kind: input, shape index: {}]   ;;  %s2536_s1 = inlined_call_operand.hbm [shape: f32[2,8,16], index: 1, kind: input, shape index: {}]   ;;  %s2537_s2 = inlined_call_operand.hbm [shape: f32[2,8,16], index: 2, kind: input, shape index: {}]   ;;  %s2538_s3 = inlined_call_operand.hbm [shape: bf16[16,32], index: 3, kind: input, shape index: {}]   ;;  %s2539_s4 = inlined_call_operand.hbm [shape: f32[1,32], index: 4, kind: input, shape index: {}]   ;;  %s2540_s5 = inlined_call_operand.hbm [shape: bf16[16,32], index: 5, kind: input, shape index: {}]   ;;  %s2541_s6 = inlined_call_operand.hbm [shape: f32[1,32], index: 6, kind: input, shape index: {}]   ;;  %s2542_s7 = inlined_call_operand.hbm [shape: bf16[16,32], index: 7, kind: input, shape index: {}]   ;;  %s2543_s8 = inlined_call_operand.hbm [shape: f32[1,32], index: 8, kind: input, shape index: {}]   ;;  %s2544_s9 = inlined_call_operand.vmem [shape: bf16[32,32], index: 9, kind: input, shape index: {}]   ;;  %s2545_s10 = inlined_call_operand.vmem [shape: f32[1,32], index: 10, kind: input, shape index: {}]   ;;  %s2546_s11 = inlined_call_operand.hbm [shape: f32[2,8,32], index: 11, kind: output, shape index: {}]  }
   0x1   :  { %2566 = sst [smem:[#allocation30_spill]] %s2538_s3 }
   0x2   :  { %2567 = sst [smem:[#allocation31_spill]] %s2540_s5 }
   0x3   :  { %2568 = sst [smem:[#allocation32_spill]] %s2542_s7 }
   0x4   :  { %2569 = sst [smem:[#allocation33_spill]] %s2545_s10 }
   0x5   :  { %2570 = sst [smem:[#allocation34_spill]] %s2546_s11 }
   0x6   :  { %16 = vsyncpa [#allocation3], 0 }
   0x7   :  { %18 = vsyncpa [#allocation3 + $0x1], 0 }
   0x8   :  { %19 = vsyncpa [#allocation6], 0 }
   0x9   :  { %21 = vsyncpa [#allocation6 + $0x1], 0 }
   0xa   :  { %22 = vsyncpa [#allocation9], 0 }
   0xb   :  { %23 = vsyncpa [#allocation12], 0 }
   0xc   :  { %24 = vsyncpa [#allocation15], 0 }
   0xd   :  { %25 = vsyncpa [#allocation4], 0 }
   0xe   :  { %27 = vsyncpa [#allocation4 + $0x1], 0  ;;  %s2148_s17 = smov 0   ;;  %s2150_s18 = smov 0  }
   0xf   :  { %s2152_s19 = smov 0   ;;  %s2154_s20 = smov 0  }
  0x10 LB: > { %2571 = sst [smem:[#allocation24_spill]] %s2054_s17  ;;  %s2068_s21 = smov [#allocation8]   ;;  %s2066_s20 = sphi %s2154_s20, %s2609_s20   ;;  %s2062_s19 = sphi %s2152_s19, %s2613_s19   ;;  %s2058_s18 = sphi %s2150_s18, %s2612_s18   ;;  %s2054_s17 = sphi %s2148_s17, %s2611_s17  }
  0x11   : > { %2572 = sst [smem:[#allocation25_spill]] %s2066_s20  ;;  %s322_s22 = sshll.u32 %s2068_s21, 4  ;;  %s323_s22 = int_to_ptr.vmem [resolvable:$true] %s322_s22 }
  0x12   : > { %s2169_s23 = sadd.s32 4294967295, %s2066_s20   ;;  %p1449_p0 = scmp.ge.s32.totalorder %s2066_s20, 1 }
  0x13   : > { %p2554_p1 = scmp.eq.s32.totalorder %s2169_s23, 0  ;;  %p310_p2 = scmp.lt.s32.totalorder %s2066_s20, 3 }
  0x14   : > { %s2069_s25 = smov [#allocation11]   ;;  %s2070_s28 = smov [#allocation14]  }
  0x15   : > { %p2174_p3 = pnand %p1449_p0, %p310_p2  ;;  %s346_s26 = sshll.u32 %s2069_s25, 4  ;;  %s2187_s26 = int_to_ptr.vmem [resolvable:$true] %s346_s26 }
  0x16   : > { %s370_s29 = sshll.u32 %s2070_s28, 4  ;;  %s1757_s12 = scalar_lea.vmem %s323_s22, 128  ;;  %s2189_s29 = int_to_ptr.vmem [resolvable:$true] %s370_s29 }
  0x17   : > { %s2573_s24 = scalar_select %p2174_p3, 1, 0 }
  0x18   : > { %p1630_p5 = pneg %p2174_p3  ;;  %p1758_p8 = scmp.ne.s32.totalorder %s323_s22, %s1757_s12 }
  0x19   : > { %p1765_p11 = scmp.lt.s32.totalorder %s323_s22, %s323_s22  ;;  %p1766_p12 = scmp.lt.s32.totalorder %s1757_s12, %s1757_s12 }
  0x1a   : > { %p2183_p6 = pnand %p1630_p5, %p2554_p1 }
  0x1b   : > { %p1767_p13 = por %p1766_p12, %p1765_p11 }
  0x1c   : > { %s2574_s27 = scalar_select %p2183_p6, 1, 0 }
  0x1d   : > { %p2193_p7 = pneg %p2183_p6 }
  0x1f   : > { %s2575_s30 = scalar_select %p2193_p7, 1, 0 }
  0x20   : > { %p1760_p9 = pnand %p1758_p8, %p2193_p7 }
  0x22   : > { %p1761_p10 = pneg %p1760_p9 }
  0x24   : > { %p1768_p0 = pnand %p1767_p13, %p1761_p10 }
  0x26   : > { %1771 = shalt.err (!%p1768_p0)
}
  0x27   : > { %s2071_s13 = smov 64   ;;  %s2072_s14 = smov 4  }
  0x28   : > { %s2576_s3 = sld [smem:[#allocation30_spill]]  ;;  %s1783_s21 = scalar_lea.vmem %s2187_s26, 128 }
  0x29   : > { %p1784_p2 = scmp.ne.s32.totalorder %s2187_s26, %s1783_s21  ;;  %p1791_p9 = scmp.lt.s32.totalorder %s2187_s26, %s2187_s26 }
  0x2a   : > { %p1792_p10 = scmp.lt.s32.totalorder %s1783_s21, %s1783_s21 }
  0x2b   : > { %p1786_p5 = pnand %p1784_p2, %p2193_p7 }
  0x2c   : > { %p1793_p11 = por %p1792_p10, %p1791_p9 }
  0x2d   : > { %p1787_p8 = pneg %p1786_p5 }
  0x2e   : > { %1633 = dma.hbm_to_vmem [thread:$0]  (!%p2183_p6), %s2576_s3, 128, %s323_s22, [#allocation9], %s2071_s13, %s2071_s13, %s2072_s14  }
  0x2f   : > { %p1794_p12 = pnand %p1793_p11, %p1787_p8 }
  0x31   : > { %1797 = shalt.err (!%p1794_p12)
}
  0x32   : > { %s2577_s5 = sld [smem:[#allocation31_spill]]  ;;  %s1809_s22 = scalar_lea.vmem %s2189_s29, 128 }
  0x33   : > { %p1810_p13 = scmp.ne.s32.totalorder %s2189_s29, %s1809_s22  ;;  %p1817_p5 = scmp.lt.s32.totalorder %s2189_s29, %s2189_s29 }
  0x34   : > { %p1818_p8 = scmp.lt.s32.totalorder %s1809_s22, %s1809_s22 }
  0x35   : > { %p1812_p0 = pnand %p1810_p13, %p2193_p7 }
  0x36   : > { %p1819_p9 = por %p1818_p8, %p1817_p5 }
  0x37   : > { %p1813_p2 = pneg %p1812_p0 }
  0x38   : > { %1639 = dma.hbm_to_vmem [thread:$0]  (!%p2183_p6), %s2577_s5, 128, %s2187_s26, [#allocation12], %s2071_s13, %s2071_s13, %s2072_s14  }
  0x39   : > { %p1820_p10 = pnand %p1819_p9, %p1813_p2 }
  0x3b   : > { %1823 = shalt.err (!%p1820_p10)
}
  0x3c   : > { %s2578_s7 = sld [smem:[#allocation32_spill]]  ;;  %s1448_s26 = sadd.s32 4294967294, %s2066_s20  }
  0x3d   : > { %s2230_s16 = sadd.s32 1, %s2066_s20   ;;  %s40_s21 = sadd.s32 1, %s2062_s19 }
  0x3e   : > { %2579 = sst [smem:[#allocation26_spill]] %s2230_s16  ;;  %s37_s25 = ssub.s32 %s2066_s20, %s2230_s16 }
  0x3f   : > { %p47_p11 = scmp.ne.s32.totalorder %s2062_s19, %s2058_s18  ;;  %p38_p12 = scmp.eq.s32.totalorder %s37_s25, 0 }
  0x40   : > { %p48_p13 = scmp.eq.s32.totalorder %s2066_s20, 0  ;;  %p53_p0 = scmp.ne.s32.totalorder %s2058_s18, %s2054_s17 }
  0x41   : > { %p297_p2 = scmp.eq.s32.totalorder %s2169_s23, 1  ;;  %p303_p10 = scmp.eq.s32.totalorder %s1448_s26, 1 }
  0x42   : > { %1645 = dma.hbm_to_vmem [thread:$0]  (!%p2183_p6), %s2578_s7, 128, %s2189_s29, [#allocation15], %s2071_s13, %s2071_s13, %s2072_s14  }
  0x43   : > { %s2242_s28 = scalar_select %p38_p12, %s2062_s19, %s40_s21  }
  0x44   : > { %p49_p5 = por %p48_p13, %p47_p11  ;;  %p2246_p8 = por %p2554_p1, %p53_p0 }
  0x45   : > { %2580 = sst [smem:[#allocation27_spill]] %s2242_s28  ;;  %p2250_p9 = por %p297_p2, %p47_p11 }
  0x46   : > { %s2581_s29 = scalar_select %p2246_p8, 1, 0 }
  0x47   : > { %s2582_s13 = scalar_select %p2250_p9, 1, 0 }
  0x48   : > { %p1669_p4 = scmp.lt.s32.totalorder %s2066_s20, 2  ;;  %s2548_s14 = sand.u32 1, %s2062_s19  }
  0x49   : > { %2583 = sst [smem:[#allocation28_spill]] %s2582_s13  ;;  %p2256_p3 = por %p303_p10, %p53_p0 }
  0x4a   : > { %s2262_s12 = sshll.u32 %s2548_s14, 3  ;;  %s2265_s15 = sshll.u32 %s2066_s20, 7 }
  0x4b   : > { %s2584_s22 = scalar_select %p2256_p3, 1, 0 }
  0x4c   : > { %p2267_p12 = pnand %p1669_p4, %p49_p5  ;;  %s419_s25 = sand.u32 1, %s2066_s20  }
  0x4d   : > { %2585 = sst [smem:[#allocation29_spill]] %s2584_s22  ;;  %s2276_s5 = scalar_lea.hbm %s2536_s1, %s2265_s15 }
  0x4e   : > { %s2586_s21 = scalar_select %p2267_p12, 1, 0 }
  0x4f   : > { %s423_s14 = scalar_lea.vmem [#allocation5], %s2262_s12  ;;  %s2279_s28 = scalar_lea.sflag [#allocation6], %s419_s25 }
  0x50   : > { %s430_s7 = sshll.u32 %s423_s14, 4  ;;  %s1824_s16 = scalar_lea.hbm %s2276_s5, 128  ;;  %s431_s7 = int_to_ptr.vmem [resolvable:$true] %s430_s7 }
  0x51   : > { %p1825_p4 = scmp.ne.s32.totalorder %s2276_s5, %s1824_s16  ;;  %p2285_p11 = pneg %p2267_p12 }
  0x52   : > { %s1829_s20 = scalar_lea.hbm %s2536_s1, 256  ;;  %p1830_p2 = scmp.lt.s32.totalorder %s2276_s5, %s2536_s1 }
  0x53   : > { %p1827_p13 = pnand %p2285_p11, %p1825_p4  ;;  %p1831_p5 = scmp.lt.s32.totalorder %s1829_s20, %s1824_s16 }
  0x55   : > { %p1828_p0 = pneg %p1827_p13  ;;  %p1832_p10 = por %p1831_p5, %p1830_p2 }
  0x57   : > { %p1833_p1 = pnand %p1832_p10, %p1828_p0 }
  0x59   : > { %1836 = shalt.err (!%p1833_p1)
}
  0x5a   : > { %s1837_s25 = scalar_lea.vmem %s431_s7, 128  ;;  %s2073_s11 = smov [#allocation5]  }
  0x5b   : > { %p1838_p3 = scmp.ne.s32.totalorder %s431_s7, %s1837_s25  ;;  %s1842_s10 = sshll.u32 %s2073_s11, 4  ;;  %s1843_s10 = int_to_ptr.vmem [resolvable:$false] %s1842_s10 }
  0x5c   : > { %s1844_s13 = scalar_lea.vmem %s1843_s10, 256  ;;  %p1845_p4 = scmp.lt.s32.totalorder %s431_s7, %s1843_s10 }
  0x5d   : > { %p1840_p9 = pnand %p1838_p3, %p2285_p11  ;;  %p1846_p13 = scmp.lt.s32.totalorder %s1844_s13, %s1837_s25 }
  0x5f   : > { %p1841_p8 = pneg %p1840_p9  ;;  %p1847_p6 = por %p1846_p13, %p1845_p4 }
  0x61   : > { %p1848_p7 = pnand %p1847_p6, %p1841_p8 }
  0x63   : > { %1851 = shalt.err (!%p1848_p7)
}
  0x64   : > { %1655 = dma.hbm_to_vmem [thread:$0]  (!%p2267_p12), %s2276_s5, 128, %s431_s7, %s2279_s28  }
  0x65   : > { %s2074_s17 = smov [#allocation10]   ;;  %s2075_s16 = smov [#allocation13]  }
  0x66   : > { %s336_s20 = sshll.u32 %s2074_s17, 4  ;;  %s360_s3 = sshll.u32 %s2075_s16, 4  ;;  %s337_s20 = int_to_ptr.vmem [resolvable:$true] %s336_s20  ;;  %s361_s3 = int_to_ptr.vmem [resolvable:$true] %s360_s3 }
  0x67   : > { %s1863_s26 = scalar_lea.vmem %s337_s20, 16  ;;  %p2588_p3 = scmp.ne.s32.totalorder %s2575_s30, 0 }
  0x68   : > { %p1864_p1 = scmp.ne.s32.totalorder %s337_s20, %s1863_s26  ;;  %s1870_s10 = scalar_lea.vmem %s337_s20, 32 }
  0x69   : > { %p1871_p2 = scmp.lt.s32.totalorder %s337_s20, %s337_s20  ;;  %p1872_p6 = scmp.lt.s32.totalorder %s1870_s10, %s1863_s26 }
  0x6a   : > { %p1866_p9 = pnand %p1864_p1, %p2588_p3 }
  0x6b   : > { %p1873_p7 = por %p1872_p6, %p1871_p2 }
  0x6c   : > { %p1867_p0 = pneg %p1866_p9 }
  0x6e   : > { %p1874_p8 = pnand %p1873_p7, %p1867_p0 }
  0x70   : > { %1877 = shalt.err (!%p1874_p8)
}
  0x71   : > { %p2589_p5 = scmp.ne.s32.totalorder %s2574_s27, 0  ;;  %s1889_s7 = scalar_lea.vmem %s361_s3, 16 }
  0x72   : > { %p1890_p10 = scmp.ne.s32.totalorder %s361_s3, %s1889_s7  ;;  %s1896_s13 = scalar_lea.vmem %s361_s3, 32 }
  0x73   : > { %1636 = dma.hbm_to_vmem [thread:$0]  (!%p2589_p5), %s2539_s4, 16, %s337_s20, [#allocation9]  }
  0x74   : > { %p1892_p4 = pnand %p1890_p10, %p2588_p3  ;;  %p1897_p1 = scmp.lt.s32.totalorder %s361_s3, %s361_s3 }
  0x75   : > { %p1898_p9 = scmp.lt.s32.totalorder %s1896_s13, %s1889_s7 }
  0x76   : > { %p1893_p13 = pneg %p1892_p4 }
  0x77   : > { %p1899_p12 = por %p1898_p9, %p1897_p1 }
  0x79   : > { %p1900_p2 = pnand %p1899_p12, %p1893_p13 }
  0x7b   : > { %1903 = shalt.err (!%p1900_p2)
}
  0x7c   : > { %1642 = dma.hbm_to_vmem [thread:$0]  (!%p2589_p5), %s2541_s6, 16, %s361_s3, [#allocation12]  }
  0x7d   : > { %s2076_s17 = smov [#allocation16]  }
  0x7e   : > { %s384_s20 = sshll.u32 %s2076_s17, 4  ;;  %s385_s20 = int_to_ptr.vmem [resolvable:$true] %s384_s20 }
  0x7f   : > { %s1915_s16 = scalar_lea.vmem %s385_s20, 16  ;;  %s1922_s26 = scalar_lea.vmem %s385_s20, 32 }
  0x80   : > { %p1916_p0 = scmp.ne.s32.totalorder %s385_s20, %s1915_s16  ;;  %p1923_p8 = scmp.lt.s32.totalorder %s385_s20, %s385_s20 }
  0x81   : > { %p1924_p10 = scmp.lt.s32.totalorder %s1922_s26, %s1915_s16 }
  0x82   : > { %p1918_p6 = pnand %p1916_p0, %p2588_p3 }
  0x83   : > { %p1925_p12 = por %p1924_p10, %p1923_p8 }
  0x84   : > { %p1919_p7 = pneg %p1918_p6 }
  0x86   : > { %p1926_p4 = pnand %p1925_p12, %p1919_p7 }
  0x88   : > { %1929 = shalt.err (!%p1926_p4)
}
  0x89   : > { %1648 = dma.hbm_to_vmem [thread:$0]  (!%p2589_p5), %s2543_s8, 16, %s385_s20, [#allocation15]  }
  0x8a   : > { %s2329_s5 = scalar_lea.hbm %s2535_s0, %s2265_s15  ;;  %s405_s7 = scalar_lea.vmem [#allocation2], %s2262_s12 }
  0x8b   : > { %s412_s13 = sshll.u32 %s405_s7, 4  ;;  %s2590_s27 = sand.u32 1, %s2062_s19   ;;  %s413_s13 = int_to_ptr.vmem [resolvable:$true] %s412_s13 }
  0x8c   : > { %s402_s14 = scalar_lea.sflag [#allocation3], %s2590_s27  ;;  %s1930_s25 = scalar_lea.hbm %s2329_s5, 128 }
  0x8d   : > { %p1931_p3 = scmp.ne.s32.totalorder %s2329_s5, %s1930_s25  ;;  %s1935_s16 = scalar_lea.hbm %s2535_s0, 256 }
  0x8e   : > { %p1936_p5 = scmp.lt.s32.totalorder %s2329_s5, %s2535_s0  ;;  %p1937_p9 = scmp.lt.s32.totalorder %s1935_s16, %s1930_s25 }
  0x8f   : > { %p1933_p13 = pnand %p1931_p3, %p2285_p11 }
  0x90   : > { %p1938_p2 = por %p1937_p9, %p1936_p5 }
  0x91   : > { %p1934_p1 = pneg %p1933_p13 }
  0x93   : > { %p1939_p0 = pnand %p1938_p2, %p1934_p1 }
  0x95   : > { %1942 = shalt.err (!%p1939_p0)
}
  0x96   : > { %s1943_s11 = scalar_lea.vmem %s413_s13, 128  ;;  %s2077_s3 = smov [#allocation2]  }
  0x97   : > { %p1944_p6 = scmp.ne.s32.totalorder %s413_s13, %s1943_s11  ;;  %s1948_s30 = sshll.u32 %s2077_s3, 4  ;;  %s1949_s30 = int_to_ptr.vmem [resolvable:$false] %s1948_s30 }
  0x98   : > { %s1950_s7 = scalar_lea.vmem %s1949_s30, 256  ;;  %p1951_p10 = scmp.lt.s32.totalorder %s413_s13, %s1949_s30 }
  0x99   : > { %p1946_p7 = pnand %p1944_p6, %p2285_p11  ;;  %p1952_p12 = scmp.lt.s32.totalorder %s1950_s7, %s1943_s11 }
  0x9b   : > { %p1947_p8 = pneg %p1946_p7  ;;  %p1953_p4 = por %p1952_p12, %p1951_p10 }
  0x9d   : > { %p1954_p3 = pnand %p1953_p4, %p1947_p8 }
  0x9f   : > { %1957 = shalt.err (!%p1954_p3)
}
  0xa0   : > { %p2591_p13 = scmp.ne.s32.totalorder %s2586_s21, 0  ;;  %s446_s17 = scalar_lea.hbm %s2537_s2, %s2265_s15 }
  0xa1   : > { %s441_s20 = scalar_lea.vmem [#allocation7], %s2262_s12  ;;  %s1958_s26 = scalar_lea.hbm %s446_s17, 128 }
  0xa2   : > { %1652 = dma.hbm_to_vmem [thread:$0]  (!%p2591_p13), %s2329_s5, 128, %s413_s13, %s402_s14  }
  0xa3   : > { %s448_s16 = sshll.u32 %s441_s20, 4  ;;  %p1959_p1 = scmp.ne.s32.totalorder %s446_s17, %s1958_s26  ;;  %s449_s16 = int_to_ptr.vmem [resolvable:$true] %s448_s16 }
  0xa4   : > { %s1963_s3 = scalar_lea.hbm %s2537_s2, 256  ;;  %p1964_p2 = scmp.lt.s32.totalorder %s446_s17, %s2537_s2 }
  0xa5   : > { %p1961_p5 = pnand %p1959_p1, %p2285_p11  ;;  %p1965_p0 = scmp.lt.s32.totalorder %s1963_s3, %s1958_s26 }
  0xa7   : > { %p1962_p9 = pneg %p1961_p5  ;;  %p1966_p6 = por %p1965_p0, %p1964_p2 }
  0xa9   : > { %p1967_p7 = pnand %p1966_p6, %p1962_p9 }
  0xab   : > { %1970 = shalt.err (!%p1967_p7)
}
  0xac   : > { %s1971_s12 = scalar_lea.vmem %s449_s16, 128  ;;  %s2078_s15 = smov [#allocation7]  }
  0xad   : > { %p1972_p8 = scmp.ne.s32.totalorder %s449_s16, %s1971_s12  ;;  %s1976_s5 = sshll.u32 %s2078_s15, 4  ;;  %s1977_s5 = int_to_ptr.vmem [resolvable:$false] %s1976_s5 }
  0xae   : > { %s1978_s13 = scalar_lea.vmem %s1977_s5, 256  ;;  %p1979_p4 = scmp.lt.s32.totalorder %s449_s16, %s1977_s5 }
  0xaf   : > { %p1974_p10 = pnand %p1972_p8, %p2285_p11  ;;  %p1980_p3 = scmp.lt.s32.totalorder %s1978_s13, %s1971_s12 }
  0xb1   : > { %p1975_p12 = pneg %p1974_p10  ;;  %p1981_p1 = por %p1980_p3, %p1979_p4 }
  0xb3   : > { %p1982_p5 = pnand %p1981_p1, %p1975_p12 }
  0xb5   : > { %1985 = shalt.err (!%p1982_p5)
}
  0xb6   : > { %1658 = dma.hbm_to_vmem [thread:$0]  (!%p2591_p13), %s446_s17, 128, %s449_s16, %s2279_s28  }
  0xb7   : > { %p2592_p9 = scmp.ne.s32.totalorder %s2573_s24, 0 }
  0xb8   : > { %s2371_s22 = sand.u32 (!%p2592_p9), 1, %s2058_s18   ;;  %p2593_p11 = scmp.ne.s32.totalorder (!%p2592_p9), %s2581_s29, 0 }
  0xb9   : > { %457 = sbr.rel (%p2592_p9) target bundleno = 1573 (0x625), region = 64  ;;  %s2374_s14 = sshll.u32 (!%p2592_p9), %s2371_s22, 3 }
  0xba   : > { %s460_s27 = scalar_lea.sflag (!%p2592_p9), [#allocation3], %s2371_s22  ;;  %s463_s25 = scalar_lea.vmem (!%p2592_p9), [#allocation2], %s2374_s14 }
  0xbe   : > { %2029 = dma.done.wait (%p2593_p11), %s460_s27, 128  }
  0xbf   : > { %2031 = vsyncadd (%p2593_p11), %s460_s27, 4294967168  ;;  %s468_s24 = sand.u32 1, %s2169_s23   ;;  %s472_s21 = scalar_lea.vmem [#allocation5], %s2374_s14 }
  0xc0   : > { %s469_s28 = scalar_lea.sflag [#allocation6], %s468_s24 }
  0xc1   : > { %2033 = dma.done.wait (%p2593_p11), %s469_s28, 256  }
  0xc2   : > { %2035 = vsyncadd (%p2593_p11), %s469_s28, 4294967040  ;;  %s481_s17 = scalar_lea.vmem [#allocation7], %s2374_s14  ;;  %p2594_p13 = scmp.eq.s32.totalorder %s2169_s23, 0 }
  0xc4   : > { %2037 = dma.done.wait (%p2594_p13), [#allocation9], 144   ;;  %p2595_p2 = pmov %p2594_p13 }
  0xc6   : > { %2039 = vsyncadd (%p2595_p2), [#allocation9], 4294967152  ;;  %p2596_p0 = pmov %p2595_p2 }
  0xc8   : > { %2041 = dma.done.wait (%p2596_p0), [#allocation12], 144   ;;  %p2597_p6 = pmov %p2596_p0 }
  0xc9   : > { %p2598_p7 = pmov %p2596_p0 }
  0xca   : > { %2043 = vsyncadd (%p2597_p6), [#allocation12], 4294967152 }
  0xcb   : > { %2045 = dma.done.wait (%p2598_p7), [#allocation15], 144   ;;  %p2599_p8 = pmov %p2596_p0 }
  0xcc   : > { %v2079_v0 = vmov 0.0   ;;  %vm2080_vm0 = vmmov 0   ;;  %v1725_v1 = vld [vmem:[#allocation8] sm:$0xff]   ;;  %v1726_v2 = vld [vmem:[#allocation11] sm:$0xff]   ;;  %vm572_vm1 = vcmask 130048   ;;  %vm740_vm2 = vcmask 64512  }
  0xcd   : > { %2047 = vsyncadd (%p2599_p8), [#allocation15], 4294967152  ;;  %1524 = vmatprep.subr.bf16.mxu0 %v2079_v0  ;;  %1530 = vmatprep.subr.bf16.mxu1 %v2079_v0  ;;  %v555_v3 = vld [vmem:[%s463_s25] sm:$0xff]  ;;  %v616_v4 = vld [vmem:[%s472_s21] sm:$0xff]  ;;  %s2081_s29 = smov 112   ;;  %s2082_s20 = smov 120  }
  0xce   : > { %1526 = vmatprep.mubr.msk.bf16.mxu0 %vm2080_vm0, %v2079_v0  ;;  %1532 = vmatprep.mubr.msk.bf16.mxu1 %vm2080_vm0, %v2079_v0  ;;  %v556_v5 = vpack.c.bf16 %v555_v3, %v555_v3  ;;  %v617_v6 = vpack.c.bf16 %v616_v4, %v616_v4  ;;  %v1474_v7 = vld [vmem:[#allocation10] ss:$0 sm:$0xff]  ;;  %v1477_v8 = vld [vmem:[#allocation13] ss:$0 sm:$0xff]  ;;  %s2083_s16 = smov 104   ;;  %v1727_v23 = vld [vmem:[#allocation14] sm:$0xff]  }
  0xcf   : > { %1525 = vmatpush3.bf16.msra.mxu0 %v1725_v1  ;;  %1531 = vmatpush3.bf16.msra.mxu1 %v1726_v2  ;;  %v676_v24 = vld [vmem:[%s481_s17] sm:$0xff]  ;;  %vm802_vm3 = vcmask 1043456   ;;  %s2084_s11 = smov 8   ;;  %s2085_s7 = smov 16   ;;  %vm1193_vm4 = vcmask 195584   ;;  %vm1219_vm5 = vcmask 261120  }
  0xd0   : > { %1536 = vmatprep.subr.bf16.mxu0 %v2079_v0  ;;  %1542 = vmatprep.subr.bf16.mxu1 %v2079_v0  ;;  %v677_v25 = vpack.c.bf16 %v676_v24, %v676_v24  ;;  %v1480_v40 = vld [vmem:[#allocation16] ss:$0 sm:$0xff]  ;;  %s2086_s12 = smov 24   ;;  %s2600_s15 = sld [smem:[#allocation28_spill]] }
  0xd1   : > { %s2601_s27 = sld [smem:[#allocation33_spill]]  ;;  %s1496_s25 = sshll.u32 %s2169_s23, 7 }
  0xd2   : > { %1527 = vmatmul.mubr.msk.bf16.vlgmr.msra.gmra.mxu0 %vm572_vm1, %v556_v5  ;;  %1533 = vmatmul.mubr.msk.bf16.vlgmr.msra.gmra.mxu1 %vm572_vm1, %v617_v6  ;;  %s553_s24 = scalar_lea.vmem [#allocation17], %s2374_s14  ;;  %s2087_s23 = smov [#allocation17]  }
  0xd3   : > { %1538 = vmatprep.mubr.msk.bf16.mxu0 %vm2080_vm0, %v2079_v0  ;;  %1544 = vmatprep.mubr.msk.bf16.mxu1 %vm2080_vm0, %v2079_v0  ;;  %s1278_s28 = sshll.u32 %s553_s24, 4  ;;  %s1990_s14 = sshll.u32 %s2087_s23, 4  ;;  %s2494_s28 = int_to_ptr.vmem [resolvable:$true] %s1278_s28  ;;  %s1991_s14 = int_to_ptr.vmem [resolvable:$false] %s1990_s14 }
  0xd4   : > { %1537 = vmatpush3.bf16.msra.mxu0 %v1727_v23  ;;  %s1986_s26 = scalar_lea.vmem %s2494_s28, 128  ;;  %s1992_s10 = scalar_lea.vmem %s1991_s14, 256 }
  0xd5   : > { %1548 = vmatprep.subr.bf16.mxu0 %v2079_v0  ;;  %p1987_p10 = scmp.ne.s32.totalorder %s2494_s28, %s1986_s26  ;;  %p1993_p1 = scmp.lt.s32.totalorder %s2494_s28, %s1991_s14 }
  0xd6   : > { %p2603_p12 = scmp.ne.s32.totalorder %s2600_s15, 0  ;;  %p1994_p5 = scmp.lt.s32.totalorder %s1992_s10, %s1986_s26 }
  0xd8   : > { %p1988_p4 = pnand %p1987_p10, %p2603_p12  ;;  %p1995_p9 = por %p1994_p5, %p1993_p1 }
  0xda   : > { %1539 = vmatmul.mubr.msk.bf16.vlgmr.msra.gmra.mxu0 %vm572_vm1, %v677_v25  ;;  %p1989_p3 = pneg %p1988_p4 }
  0xdb   : > { %1550 = vmatprep.mubr.msk.bf16.mxu0 %vm2080_vm0, %v2079_v0 }
  0xdc   : > { %p1996_p11 = pnand %p1995_p9, %p1989_p3 }
 0x192   : > { %v610_v9 = vpop.f32.mrf.mxu0  ;;  %v670_v11 = vpop.f32.mrf.mxu1 }
 0x193   : > { %v611_v10 = vadd.f32 %v1474_v7, %v610_v9  ;;  %v671_v12 = vadd.f32 %v1477_v8, %v670_v11 }
 0x194   : > { %v1528_v13 = vpop.f32.mrf.mxu0  ;;  %v1534_v15 = vpop.f32.mrf.mxu1 }
 0x195   : > { %v736_v14 = vmul.f32 0.35355338, %v611_v10  ;;  %v738_v16 = vpack.c.bf16 %v671_v12, %v671_v12 }
 0x196   : > { %v613_v17 = vpop.f32.mrf.mxu0  ;;  %v673_v18 = vpop.f32.mrf.mxu1 }
 0x197   : > { %v737_v19 = vpack.c.bf16 %v736_v14, %v736_v14  ;;  %961 = vrot.lane.b32.xlu1 %v738_v16, %s2081_s29  ;;  %850 = vrot.lane.b32.xlu0 %v738_v16, %s2082_s20  ;;  %v745_v21 = vsel %vm740_vm2, %v738_v16, 0 }
 0x198   : > { %v1529_v20 = vpop.f32.mrf.mxu0  ;;  %v1535_v22 = vpop.f32.mrf.mxu1  ;;  %1543 = vmatpush3.bf16.xpose.msra.mxu1 %v745_v21 }
 0x199   : > { %1554 = vmatprep.subr.bf16.mxu1 %v2079_v0 }
 0x19a   : > { %v730_v41 = vpop.f32.mrf.mxu0 }
 0x19b   : > { %959 = vrot.lane.b32.xlu1 %v737_v19, %s2081_s29  ;;  %847 = vrot.lane.b32.xlu0 %v737_v19, %s2082_s20  ;;  %v731_v42 = vadd.f32 %v1480_v40, %v730_v41 }
 0x19c   : > { %v1540_v43 = vpop.f32.mrf.mxu0 }
 0x19d   : > { %v739_v44 = vpack.c.bf16 %v731_v42, %v731_v42 }
 0x19e   : > { %v733_v45 = vpop.f32.mrf.mxu0 }
 0x19f   : > { %1069 = vrot.lane.b32.xlu1 %v737_v19, %s2083_s16  ;;  %1071 = vrot.lane.b32.xlu0 %v738_v16, %s2083_s16  ;;  %v804_v46 = vsel %vm802_vm3, %v739_v44, 0 }
 0x1a0   : > { %1545 = vmatmul.mubr.msk.bf16.vlgmr.msra.gmra.mxu1 %vm740_vm2, %v737_v19  ;;  %v1541_v47 = vpop.f32.mrf.mxu0  ;;  %1549 = vmatpush3.bf16.msra.mxu0 %v804_v46  ;;  %v1728_v46 = vld [vmem:[%s2544_s9 + $0x8] sm:$0xff]  }
 0x1a1   : > { %1556 = vmatprep.mubr.msk.bf16.mxu1 %vm2080_vm0, %v2079_v0  ;;  %1560 = vmatprep.subr.bf16.mxu0 %v2079_v0 }
 0x209   : > { %v851_v26 = vpop.permute.xlu0 %850  ;;  %v962_v28 = vpop.permute.xlu1 %961 }
 0x20a   : > { %v856_v27 = vsel %vm740_vm2, %v851_v26, 0  ;;  %v967_v30 = vsel %vm740_vm2, %v962_v28, 0 }
 0x20b   : > { %1555 = vmatpush3.bf16.xpose.msra.mxu1 %v856_v27 }
 0x20c   : > { %1566 = vmatprep.subr.bf16.mxu1 %v2079_v0 }
 0x20d   : > { %v848_v29 = vpop.permute.xlu0 %847  ;;  %v960_v32 = vpop.permute.xlu1 %959 }
 0x211   : > { %v1072_v31 = vpop.permute.xlu0 %1071  ;;  %v1070_v34 = vpop.permute.xlu1 %1069 }
 0x212   : > { %1557 = vmatmul.mubr.msk.bf16.vlgmr.msra.gmra.mxu1 %vm740_vm2, %v848_v29  ;;  %v1077_v33 = vsel %vm740_vm2, %v1072_v31, 0 }
 0x213   : > { %1567 = vmatpush3.bf16.xpose.msra.mxu1 %v967_v30  ;;  %1568 = vmatprep.mubr.msk.bf16.mxu1 %vm2080_vm0, %v2079_v0 }
 0x214   : > { %1578 = vmatprep.subr.bf16.mxu1 %v2079_v0 }
 0x21a   : > { %1569 = vmatmul.mubr.msk.bf16.vlgmr.msra.gmra.mxu1 %vm740_vm2, %v960_v32 }
 0x21b   : > { %1579 = vmatpush3.bf16.xpose.msra.mxu1 %v1077_v33  ;;  %1580 = vmatprep.mubr.msk.bf16.mxu1 %vm2080_vm0, %v2079_v0 }
 0x21c   : > { %1590 = vmatprep.subr.bf16.mxu1 %v2079_v0 }
 0x222   : > { %1581 = vmatmul.mubr.msk.bf16.vlgmr.msra.gmra.mxu1 %vm740_vm2, %v1070_v34 }
 0x223   : > { %1594 = vmatprep.mubr.msk.bf16.mxu1 %vm2080_vm0, %v2079_v0  ;;  %1591 = vmatpush3.bf16.msra.mxu1 %v1728_v46 }
 0x224   : > { %1592 = vmatprep.subr.bf16.mxu1 %v2079_v0 }
 0x260   : > { %v781_v35 = vpop.f32.mrf.mxu1 }
 0x261   : > { %v787_v36 = vsel %vm740_vm2, %v781_v35, -inf }
 0x262   : > { %788 = vmax.xlane.f32.xlu0 %v787_v36  ;;  %v1546_v37 = vpop.f32.mrf.mxu1 }
 0x264   : > { %v784_v38 = vpop.f32.mrf.mxu1 }
 0x266   : > { %v1547_v39 = vpop.f32.mrf.mxu1 }
 0x2d2   : > { %v892_v48 = vpop.f32.mrf.mxu1 }
 0x2d3   : > { %v898_v49 = vsel %vm740_vm2, %v892_v48, -inf }
 0x2d4   : > { %899 = vmax.xlane.f32.xlu1 %v898_v49  ;;  %v1558_v50 = vpop.f32.mrf.mxu1  ;;  %v1729_v49 = vld [vmem:[%s2544_s9] sm:$0xff]  }
 0x2d5   : > { %1593 = vmatpush3.bf16.msra.mxu1 %v1729_v49 }
 0x2d6   : > { %v895_v51 = vpop.f32.mrf.mxu1 }
 0x2d8   : > { %v1559_v52 = vpop.f32.mrf.mxu1 }
 0x2da   : > { %v1003_v53 = vpop.f32.mrf.mxu1 }
 0x2db   : > { %v1009_v54 = vsel %vm740_vm2, %v1003_v53, -inf }
 0x2dc   : > { %1010 = vmax.xlane.f32.xlu0 %v1009_v54  ;;  %v1570_v55 = vpop.f32.mrf.mxu1 }
 0x2de   : > { %v1006_v56 = vpop.f32.mrf.mxu1 }
 0x2e0   : > { %v1571_v57 = vpop.f32.mrf.mxu1 }
 0x2e2   : > { %v1113_v58 = vpop.f32.mrf.mxu1 }
 0x2e3   : > { %v1119_v59 = vsel %vm740_vm2, %v1113_v58, -inf }
 0x2e4   : > { %1120 = vmax.xlane.f32.xlu0 %v1119_v59  ;;  %v1582_v60 = vpop.f32.mrf.mxu1 }
 0x2e6   : > { %v1116_v61 = vpop.f32.mrf.mxu1 }
 0x2e8   : > { %v1583_v62 = vpop.f32.mrf.mxu1 }
 0x2eb   : > { %v789_v63 = vpop.xlane.xlu0 %788 }
 0x2ec   : > { %v790_v1 = vsub.f32 %v781_v35, %v789_v63 }
 0x2ee   : > { %v791_v2 = vmul.f32 1.442695, %v790_v1 }
 0x2f0   : > { %1730 = vpow2.f32 %v791_v2 }
 0x2fd   : > { %v1731_v3 = vpop.eup %1730 }
 0x2fe   : > { %v793_v4 = vsel %vm740_vm2, %v1731_v3, 0.0 }
 0x2ff   : > { %794 = vadd.xlane.f32.xlu1 %v793_v4 }
 0x310   : > { %911 = vrot.lane.b32.xlu1 %v739_v44, %s2082_s20 }
 0x35d   : > { %v900_v5 = vpop.xlane.xlu1 %899 }
 0x35e   : > { %v901_v6 = vsub.f32 %v892_v48, %v900_v5 }
 0x360   : > { %v902_v7 = vmul.f32 1.442695, %v901_v6 }
 0x362   : > { %1732 = vpow2.f32 %v902_v7 }
 0x365   : > { %v1011_v8 = vpop.xlane.xlu0 %1010 }
 0x366   : > { %v1012_v9 = vsub.f32 %v1003_v53, %v1011_v8 }
 0x368   : > { %v1013_v10 = vmul.f32 1.442695, %v1012_v9 }
 0x36a   : > { %1734 = vpow2.f32 %v1013_v10 }
 0x36d   : > { %v1121_v11 = vpop.xlane.xlu0 %1120 }
 0x36e   : > { %v1122_v12 = vsub.f32 %v1113_v58, %v1121_v11 }
 0x36f   : > { %v1733_v13 = vpop.eup %1732 }
 0x370   : > { %v1123_v14 = vmul.f32 1.442695, %v1122_v12  ;;  %v904_v15 = vsel %vm740_vm2, %v1733_v13, 0.0 }
 0x371   : > { %905 = vadd.xlane.f32.xlu0 %v904_v15 }
 0x372   : > { %1736 = vpow2.f32 %v1123_v14 }
 0x377   : > { %v1735_v16 = vpop.eup %1734 }
 0x378   : > { %v1015_v17 = vsel %vm740_vm2, %v1735_v16, 0.0 }
 0x379   : > { %1016 = vadd.xlane.f32.xlu1 %v1015_v17 }
 0x37f   : > { %v1737_v18 = vpop.eup %1736 }
 0x380   : > { %v1125_v19 = vsel %vm740_vm2, %v1737_v18, 0.0 }
 0x381   : > { %1126 = vadd.xlane.f32.xlu0 %v1125_v19 }
 0x388   : > { %v795_v20 = vpop.xlane.xlu1 %794 }
 0x389   : > { %1738 = vrcp.f32 %v795_v20 }
 0x38a   : > { %1131 = vrot.lane.b32.xlu1 %v739_v44, %s2083_s16  ;;  %s1265_s16 = scalar_lea.sflag [#allocation4], %s2371_s22 }
 0x38c   : > { %v912_v22 = vpop.permute.xlu1 %911 }
 0x38d   : > { %v917_v25 = vsel %vm802_vm3, %v912_v22, 0 }
 0x396   : > { %v1739_v21 = vpop.eup %1738 }
 0x397   : > { %1021 = vrot.lane.b32.xlu0 %v739_v44, %s2081_s29  ;;  %v797_v23 = vmul.f32 %v1739_v21, %v1731_v3  ;;  %v1491_v3 = vld [vmem:[%s2601_s27] ss:$0 sm:$0xff]  ;;  %s2602_s29 = sld [smem:[#allocation34_spill]] }
 0x399   : > { %v798_v24 = vpack.c.bf16 %v797_v23, %v797_v23 }
 0x39b   : > { %1551 = vmatmul.mubr.msk.bf16.vlgmr.msra.gmra.mxu0 %vm740_vm2, %v798_v24 }
 0x39c   : > { %1561 = vmatpush3.bf16.msra.mxu0 %v917_v25  ;;  %1562 = vmatprep.mubr.msk.bf16.mxu0 %vm2080_vm0, %v2079_v0 }
 0x39d   : > { %1572 = vmatprep.subr.bf16.mxu0 %v2079_v0  ;;  %s2492_s20 = scalar_lea.hbm %s2602_s29, %s1496_s25 }
 0x3fa   : > { %v906_v26 = vpop.xlane.xlu0 %905 }
 0x3fb   : > { %1740 = vrcp.f32 %v906_v26 }
 0x402   : > { %v1017_v27 = vpop.xlane.xlu1 %1016 }
 0x403   : > { %1742 = vrcp.f32 %v1017_v27 }
 0x406   : > { %v1132_v36 = vpop.permute.xlu1 %1131 }
 0x407   : > { %v1137_v38 = vsel %vm802_vm3, %v1132_v36, 0 }
 0x408   : > { %v1741_v28 = vpop.eup %1740 }
 0x409   : > { %v908_v29 = vmul.f32 %v1741_v28, %v1733_v13 }
 0x40a   : > { %v1127_v30 = vpop.xlane.xlu0 %1126 }
 0x40b   : > { %1744 = vrcp.f32 %v1127_v30  ;;  %v909_v31 = vpack.c.bf16 %v908_v29, %v908_v29 }
 0x40d   : > { %1563 = vmatmul.mubr.msk.bf16.vlgmr.msra.gmra.mxu0 %vm740_vm2, %v909_v31 }
 0x40e   : > { %v1022_v32 = vpop.permute.xlu0 %1021  ;;  %1574 = vmatprep.mubr.msk.bf16.mxu0 %vm2080_vm0, %v2079_v0 }
 0x40f   : > { %v1027_v33 = vsel %vm802_vm3, %v1022_v32, 0 }
 0x410   : > { %v1743_v34 = vpop.eup %1742  ;;  %1573 = vmatpush3.bf16.msra.mxu0 %v1027_v33 }
 0x411   : > { %1584 = vmatprep.subr.bf16.mxu0 %v2079_v0  ;;  %v1019_v35 = vmul.f32 %v1743_v34, %v1735_v16 }
 0x413   : > { %v1020_v37 = vpack.c.bf16 %v1019_v35, %v1019_v35 }
 0x415   : > { %1575 = vmatmul.mubr.msk.bf16.vlgmr.msra.gmra.mxu0 %vm740_vm2, %v1020_v37 }
 0x416   : > { %1585 = vmatpush3.bf16.msra.mxu0 %v1137_v38  ;;  %1586 = vmatprep.mubr.msk.bf16.mxu0 %vm2080_vm0, %v2079_v0 }
 0x418   : > { %v1745_v39 = vpop.eup %1744 }
 0x419   : > { %v1129_v40 = vmul.f32 %v1745_v39, %v1737_v18 }
 0x41b   : > { %v1130_v41 = vpack.c.bf16 %v1129_v40, %v1129_v40 }
 0x41d   : > { %1587 = vmatmul.mubr.msk.bf16.vlgmr.msra.gmra.mxu0 %vm740_vm2, %v1130_v41 }
 0x45b   : > { %v840_v42 = vpop.f32.mrf.mxu0 }
 0x45d   : > { %v1552_v43 = vpop.f32.mrf.mxu0 }
 0x45f   : > { %v843_v44 = vpop.f32.mrf.mxu0 }
 0x461   : > { %v1553_v45 = vpop.f32.mrf.mxu0 }
 0x4cd   : > { %v953_v47 = vpop.f32.mrf.mxu0 }
 0x4ce   : > { %1180 = vrot.lane.b32.xlu1 %v953_v47, %s2084_s11 }
 0x4cf   : > { %v1564_v48 = vpop.f32.mrf.mxu0 }
 0x4d1   : > { %v956_v50 = vpop.f32.mrf.mxu0 }
 0x4d3   : > { %v1565_v51 = vpop.f32.mrf.mxu0 }
 0x4d5   : > { %v1063_v52 = vpop.f32.mrf.mxu0 }
 0x4d6   : > { %1184 = vrot.lane.b32.xlu0 %v1063_v52, %s2085_s7 }
 0x4d7   : > { %v1576_v53 = vpop.f32.mrf.mxu0 }
 0x4d9   : > { %v1066_v54 = vpop.f32.mrf.mxu0 }
 0x4db   : > { %v1577_v55 = vpop.f32.mrf.mxu0 }
 0x4dd   : > { %v1173_v56 = vpop.f32.mrf.mxu0 }
 0x4de   : > { %1188 = vrot.lane.b32.xlu1 %v1173_v56, %s2086_s12 }
 0x4df   : > { %v1588_v0 = vpop.f32.mrf.mxu0 }
 0x4e1   : > { %v1176_v57 = vpop.f32.mrf.mxu0 }
 0x4e3   : > { %v1589_v58 = vpop.f32.mrf.mxu0 }
 0x540   : > { %v1181_v59 = vpop.permute.xlu1 %1180 }
 0x541   : > { %v1191_v61 = vsel %vm740_vm2, %v840_v42, %v1181_v59 }
 0x548   : > { %v1185_v60 = vpop.permute.xlu0 %1184 }
 0x549   : > { %v1192_v62 = vsel %vm572_vm1, %v1191_v61, %v1185_v60 }
 0x550   : > { %v1189_v63 = vpop.permute.xlu1 %1188 }
 0x551   : > { %v1194_v1 = vsel %vm1193_vm4, %v1192_v62, %v1189_v63 }
 0x552   : > { %v1195_v2 = vpack.c.bf16 %v1194_v1, %v1194_v1 }
 0x554   : > { %1595 = vmatmul.mubr.msk.bf16.vlgmr.msra.gmra.mxu1 %vm1219_vm5, %v1195_v2 }
 0x614   : > { %v1257_v4 = vpop.f32.mrf.mxu1 }
 0x615   : > { %v1258_v5 = vadd.f32 %v1491_v3, %v1257_v4 }
 0x616   : > { %v1596_v6 = vpop.f32.mrf.mxu1 }
 0x617   : > { %1263 = vst.msk [vmem:[%s553_s24] sm:$0xff] %vm1219_vm5, %v1258_v5 }
 0x618   : > { %v1260_v7 = vpop.f32.mrf.mxu1 }
 0x619   : > { %1999 = shalt.err (!%p1996_p11)
}
 0x61a   : > { %s2000_s11 = scalar_lea.hbm %s2492_s20, 128  ;;  %s2004_s30 = scalar_lea.hbm %s2602_s29, 256 }
 0x61b   : > { %p2001_p13 = scmp.ne.s32.totalorder %s2492_s20, %s2000_s11  ;;  %p2005_p6 = scmp.lt.s32.totalorder %s2492_s20, %s2602_s29 }
 0x61c   : > { %p2006_p7 = scmp.lt.s32.totalorder %s2004_s30, %s2000_s11 }
 0x61d   : > { %p2002_p2 = pnand %p2001_p13, %p2603_p12 }
 0x61e   : > { %p2007_p8 = por %p2006_p7, %p2005_p6 }
 0x61f   : > { %p2003_p0 = pneg %p2002_p2 }
 0x621   : > { %p2008_p10 = pnand %p2007_p8, %p2003_p0 }
 0x623   : > { %2011 = shalt.err (!%p2008_p10)
}
 0x624   : > { %1628 = dma.vmem_to_hbm [thread:$0]  (%p2603_p12), %s2494_s28, 128, %s2492_s20, %s1265_s16   ;;  %v1597_v8 = vpop.f32.mrf.mxu1 }
 0x625 PF: > { %s2604_s5 = sld [smem:[#allocation24_spill]] }
 0x626   : > { %s2605_s13 = sld [smem:[#allocation29_spill]] }
 0x627   : > { %s2606_s27 = sld [smem:[#allocation25_spill]] }
 0x62b   : > { %s1290_s25 = sand.u32 1, %s2604_s5  }
 0x62c   : > { %p2607_p4 = scmp.ne.s32.totalorder %s2605_s13, 0  ;;  %s1291_s24 = scalar_lea.sflag [#allocation4], %s1290_s25 }
 0x62d   : > { %p2608_p3 = scmp.ge.s32.totalorder %s2606_s27, 2 }
 0x62f   : > { %p1660_p1 = pnand %p2608_p3, %p2607_p4 }
 0x631   : > { %p1661_p5 = pneg %p1660_p1 }
 0x633   : > { %2049 = dma.done.wait (%p1661_p5), %s1291_s24, 128  }
 0x634   : > { %2051 = vsyncadd (%p1661_p5), %s1291_s24, 4294967168  ;;  %s2609_s20 = sld [smem:[#allocation26_spill]]  ;;  %s2611_s17 = smov %s2058_s18 }
 0x635   : > { %s2610_s15 = sld [smem:[#allocation27_spill]]  ;;  %s2612_s18 = smov %s2062_s19 }
 0x63a   : > { %p30_p9 = scmp.ge.s32.totalorder %s2609_s20, 4  }
 0x63b   : > { %s2613_s19 = smov %s2610_s15 }
 0x63c   :  { %32 = sbr.rel (!%p30_p9) target bundleno = 16 (0x10), region = 157 }
 0x641   :  { %1296 = vsyncpa [#allocation3], 1 }
 0x642   :  { %1298 = vsyncpa [#allocation3 + $0x1], 1 }
 0x643   :  { %1299 = vsyncpa [#allocation6], 1 }
 0x644   :  { %1301 = vsyncpa [#allocation6 + $0x1], 1 }
 0x645   :  { %1302 = vsyncpa [#allocation9], 1 }
 0x646   :  { %1303 = vsyncpa [#allocation12], 1 }
 0x647   :  { %1304 = vsyncpa [#allocation15], 1 }
 0x648   :  { %1305 = vsyncpa [#allocation4], 1 }
 0x649   :  { %1307 = vsyncpa [#allocation4 + $0x1], 1 }

</bundles_post_ra>
